<compile_context>
chip_gen: v7x
topology: tpu7x:2x2x1
jax: 0.10.0
libtpu: 0.0.40
codegen_flags: <defaults>
</compile_context>

<pallas_src>
import math

import jax
import jax.numpy as jnp
from jax.experimental import pallas as pl
from jax.experimental.pallas import tpu as pltpu


def _contrast_kernel(a_ref, x_ref, o_ref):
    """Elementwise hot path: y = clip(a*x + b, 0, 1), b derived from a in-kernel."""
    a = a_ref[...].astype(jnp.float32)           # (TB, 1) per-row scale
    b = (128.0 / 255.0) * (1.0 - a)              # (TB, 1) per-row offset
    x = x_ref[...].astype(jnp.float32)           # (TB, TF)
    y = jnp.clip(a * x + b, 0.0, 1.0)
    o_ref[...] = y.astype(o_ref.dtype)


_TARGET_BLOCK_BYTES = 8 * 1024 * 1024     # ~8 MiB tiles (review guidance)
_VMEM_LIMIT_BYTES = 48 * 1024 * 1024      # 4 x 8 MiB double-buffered in+out fits on all gens


def _choose_tiles(rows, cols, itemsize):
    """TB: small multiple of 8 (16 for sub-4-byte dtypes). TF: as wide as the
    ~8 MiB block budget allows, multiple of 128 (or the full row)."""
    tb_pref = 8 if itemsize >= 4 else 16
    if rows % 8 == 0:
        tb = min(rows, tb_pref)
    elif rows < 8:
        tb = rows                          # full-dim block is always legal
    else:
        tb = tb_pref                       # cdiv grid masks the ragged last batch tile

    budget = max(128, (_TARGET_BLOCK_BYTES // (tb * itemsize)) // 128 * 128)
    if cols <= budget:
        tf = cols                          # whole row in one tile
    else:
        tf = None
        cand = budget
        while cand >= 128:                 # prefer a divisor -> no masked tail
            if cols % cand == 0:
                tf = cand
                break
            cand -= 128
        if tf is None:
            tf = budget                    # ragged tail: cdiv grid + masked last tile
    return tb, tf


def contrast_aug(x, log_lims, key):
    """JAX/Pallas equivalent of ContrastAug.forward.

    The torch.rand draw and the tiny sigmoid parameter transform are plain-JAX
    glue; the per-pixel affine + clamp streams through the Pallas kernel.
    """
    bs, C, H, W = x.shape
    flat = C * H * W

    # lims = sigmoid(log_lims) * 2 - 1
    lims = jax.nn.sigmoid(log_lims) * 2.0 - 1.0

    # contrast_change = rand(bs) * (lims[1] - lims[0]) + lims[0], scaled by 255
    u = jax.random.uniform(key, (bs,), dtype=jnp.float32)
    cc = (u * (lims[1] - lims[0]) + lims[0]) * 255.0

    # factor = 259 * (cc + 255) / (255 * (259 - cc))
    factor = 259.0 * (cc + 255.0) / (255.0 * (259.0 - cc))
    a = factor[:, None].astype(jnp.float32)                 # (bs, 1)

    # Small-batch layout fix: (bs, flat) -> (bs*R, flat/R) so rows are a
    # multiple of 8 while the last dim stays a multiple of 128.
    rows, cols, R = bs, flat, 1
    if bs % 8 != 0 and flat % 128 == 0:
        r = 8 // math.gcd(bs, 8)
        if flat % (128 * r) == 0:
            R = r
            rows, cols = bs * R, flat // R

    xf = x.reshape(rows, cols)
    a_rows = jnp.repeat(a, R, axis=0) if R > 1 else a       # (rows, 1)

    itemsize = jnp.dtype(x.dtype).itemsize
    TB, TF = _choose_tiles(rows, cols, itemsize)
    grid = (pl.cdiv(rows, TB), pl.cdiv(cols, TF))

    out = pl.pallas_call(
        _contrast_kernel,
        out_shape=jax.ShapeDtypeStruct((rows, cols), x.dtype),
        grid_spec=pl.GridSpec(
            grid=grid,
            in_specs=[
                pl.BlockSpec((TB, 1), lambda i, j: (i, 0)),     # a, tracks batch tile
                pl.BlockSpec((TB, TF), lambda i, j: (i, j)),    # x tile
            ],
            out_specs=pl.BlockSpec((TB, TF), lambda i, j: (i, j)),
        ),
        compiler_params=pltpu.CompilerParams(
            dimension_semantics=("parallel", "parallel"),
            vmem_limit_bytes=_VMEM_LIMIT_BYTES,
        ),
    )(a_rows, xf)

    return out.reshape(bs, C, H, W)


def _reference(x, log_lims, key):
    """Pure-JAX reference of the same forward (same RNG draw)."""
    bs = x.shape[0]
    lims = jax.nn.sigmoid(log_lims) * 2.0 - 1.0
    u = jax.random.uniform(key, (bs,), dtype=jnp.float32)
    cc = (u * (lims[1] - lims[0]) + lims[0]) * 255.0
    cc = cc[:, None, None, None]
    factor = 259.0 * (cc + 255.0) / (255.0 * (259.0 - cc))
    return jnp.clip(factor * (x * 255.0 - 128.0) + 128.0, 0.0, 255.0) / 255.0


if __name__ == "__main__":
    key = jax.random.PRNGKey(0)
    k_x, k_rand = jax.random.split(key)

    # Deterministic inputs / parameters (module __init__: log_lims = [-2., 2.])
    x = jax.random.uniform(k_x, (2, 4, 16, 16), dtype=jnp.float32)
    log_lims = jnp.array([-2.0, 2.0], dtype=jnp.float32)

    y = contrast_aug(x, log_lims, k_rand)
    y = jax.block_until_ready(y)

    y_ref = _reference(x, log_lims, k_rand)
    assert y.shape == x.shape and y.dtype == x.dtype
    assert jnp.allclose(y, y_ref, atol=1e-5, rtol=1e-5)

    # Extra coverage for the ragged-tail / odd-batch paths (review concern).
    x2 = jax.random.uniform(k_x, (3, 3, 10, 10), dtype=jnp.float32)  # flat=300, not %128
    y2 = jax.block_until_ready(contrast_aug(x2, log_lims, k_rand))
    y2_ref = _reference(x2, log_lims, k_rand)
    assert y2.shape == x2.shape
    assert jnp.allclose(y2, y2_ref, atol=1e-5, rtol=1e-5)

    print("KERNEL_OK")
</pallas_src>

<mosaic_0001>
module attributes {stable_mosaic.version = 11 : i64} {
  func.func @_contrast_kernel(%arg0: i32, %arg1: i32, %arg2: memref<8x1xf32, #tpu.memory_space<vmem>>, %arg3: memref<8x256xf32, #tpu.memory_space<vmem>>, %arg4: memref<8x256xf32, #tpu.memory_space<vmem>>) attributes {dimension_semantics = [#tpu.dimension_semantics<parallel>, #tpu.dimension_semantics<parallel>], iteration_bounds = array<i64: 1, 1>, scalar_prefetch = 0 : i64, scratch_operands = 0 : i64, tpu.core_type = #tpu.core_type<tc>, window_params = [{transform_indices = @transform_0, window_bounds = array<i64: 8, 1>}, {transform_indices = @transform_1, window_bounds = array<i64: 8, 256>}, {transform_indices = @transform_2, window_bounds = array<i64: 8, 256>}]} {
    %c0 = arith.constant 0 : index
    %c0_0 = arith.constant 0 : index
    %0 = vector.load %arg2[%c0, %c0_0] : memref<8x1xf32, #tpu.memory_space<vmem>>, vector<8x1xf32>
    %cst = arith.constant 1.000000e+00 : f32
    %1 = vector.broadcast %cst : f32 to vector<8x1xf32>
    %2 = arith.subf %1, %0 : vector<8x1xf32>
    %cst_1 = arith.constant 0.501960814 : f32
    %3 = vector.broadcast %cst_1 : f32 to vector<8x1xf32>
    %4 = arith.mulf %3, %2 : vector<8x1xf32>
    %c0_2 = arith.constant 0 : index
    %c0_3 = arith.constant 0 : index
    %5 = vector.load %arg3[%c0_2, %c0_3] : memref<8x256xf32, #tpu.memory_space<vmem>>, vector<8x256xf32>
    %6 = vector.broadcast %0 : vector<8x1xf32> to vector<8x256xf32>
    %7 = arith.mulf %6, %5 : vector<8x256xf32>
    %8 = vector.broadcast %4 : vector<8x1xf32> to vector<8x256xf32>
    %9 = arith.addf %7, %8 : vector<8x256xf32>
    %cst_4 = arith.constant 0.000000e+00 : f32
    %cst_5 = arith.constant 1.000000e+00 : f32
    %10 = vector.broadcast %cst_4 : f32 to vector<8x256xf32>
    %11 = arith.maximumf %10, %9 : vector<8x256xf32>
    %12 = vector.broadcast %cst_5 : f32 to vector<8x256xf32>
    %13 = arith.minimumf %12, %11 : vector<8x256xf32>
    %c0_6 = arith.constant 0 : index
    %c0_7 = arith.constant 0 : index
    %14 = vector.load %arg4[%c0_6, %c0_7] : memref<8x256xf32, #tpu.memory_space<vmem>>, vector<8x256xf32>
    tpu.vector_store %arg4[%c0_6, %c0_7], %13 {strides = array<i32>} : memref<8x256xf32, #tpu.memory_space<vmem>>, vector<8x256xf32>,
    return
  }
  func.func @transform_0(%arg0: i32, %arg1: i32) -> (i32, i32) {
    %c0_i32 = arith.constant 0 : i32
    %c0_i32_0 = arith.constant 0 : i32
    return %arg0, %c0_i32 : i32, i32
  }
  func.func @transform_1(%arg0: i32, %arg1: i32) -> (i32, i32) {
    %c0_i32 = arith.constant 0 : i32
    return %arg0, %arg1 : i32, i32
  }
  func.func @transform_2(%arg0: i32, %arg1: i32) -> (i32, i32) {
    %c0_i32 = arith.constant 0 : i32
    return %arg0, %arg1 : i32, i32
  }
}

</mosaic_0001>

<bundles_post_ra>
// kernel: tpu_custom_call.1
= control target key start
LH: loop header
LB: loop body
LE: loop exit
PB: predicated region body
PF: predicated region fallthrough
CT: control target
= control target key end

     0   :  { %7 = vsyncpa [#allocation3], 0  ;;  %s161_s0 = inlined_call_operand.vmem [shape: f32[8,1], index: 0, kind: input, shape index: {}]   ;;  %s162_s1 = inlined_call_operand.hbm [shape: f32[8,256], index: 1, kind: input, shape index: {}]   ;;  %s163_s2 = inlined_call_operand.hbm [shape: f32[8,256], index: 2, kind: output, shape index: {}]  }
   0x1   :  { %8 = vsyncpa [#allocation4], 0  ;;  %s116_s9 = smov [#allocation2]   ;;  %s68_s13 = scalar_lea.hbm %s162_s1, 256 }
   0x2   :  { %s17_s10 = sshll.u32 %s116_s9, 4  ;;  %p69_p0 = scmp.ne.s32.totalorder %s162_s1, %s68_s13  ;;  %s18_s10 = int_to_ptr.vmem [resolvable:$true] %s17_s10 }
   0x3   :  { %p72_p1 = scmp.lt.u32.totalorder %s68_s13, %s162_s1 }
   0x5   :  { %p74_p2 = pnand %p72_p1, %p69_p0 }
   0x7   :  { %77 = shalt.err (!%p74_p2)
}
   0x8   :  { %s78_s18 = scalar_lea.vmem %s18_s10, 256  ;;  %p83_p4 = scmp.lt.s32.totalorder %s18_s10, %s18_s10 }
   0x9   :  { %p79_p3 = scmp.ne.s32.totalorder %s18_s10, %s78_s18  ;;  %p84_p5 = scmp.lt.s32.totalorder %s78_s18, %s78_s18 }
   0xb   :  { %p85_p6 = por %p84_p5, %p83_p4 }
   0xd   :  { %p86_p7 = pnand %p85_p6, %p79_p3 }
   0xf   :  { %89 = shalt.err (!%p86_p7)
}
  0x10   :  { %20 = dma.hbm_to_vmem [thread:$0]  %s162_s1, 256, %s18_s10, [#allocation3]  }
  0x11   :  { %112 = dma.done.wait [#allocation3], 256  }
  0x12   :  { %113 = vsyncadd [#allocation3], 4294967040  ;;  %v117_v0 = vmov 0   ;;  %v24_v1 = vld [vmem:[%s161_s0] sm:$0xff]  ;;  %v28_v5 = vld [vmem:[#allocation2 + $0x8] sm:$0xff]  ;;  %s118_s1 = smov [#allocation5]  }
  0x13   :  { %67 = vset.pattern.permute.xlu0 %v117_v0  ;;  %v25_v2 = vsub.f32 1.0, %v24_v1  ;;  %v27_v4 = vld [vmem:[#allocation2] sm:$0xff]  ;;  %s55_s23 = sshll.u32 %s118_s1, 4  ;;  %s56_s23 = int_to_ptr.vmem [resolvable:$true] %s55_s23 }
  0x14   :  { %31 = vperm.xlu0 %67, %v24_v1   ;;  %s90_s0 = scalar_lea.vmem %s56_s23, 256  ;;  %p95_p9 = scmp.lt.s32.totalorder %s56_s23, %s56_s23 }
  0x15   :  { %v26_v3 = vmul.f32 0.5019608, %v25_v2  ;;  %p91_p8 = scmp.ne.s32.totalorder %s56_s23, %s90_s0  ;;  %p96_p10 = scmp.lt.s32.totalorder %s90_s0, %s90_s0 }
  0x17   :  { %p97_p11 = por %p96_p10, %p95_p9 }
  0x18   :  { %38 = vperm.xlu0 %67, %v26_v3  }
  0x19   :  { %p98_p12 = pnand %p97_p11, %p91_p8 }
  0x93   :  { %v32_v6 = vpop.permute.xlu0 %31 }
  0x94   :  { %v34_v7 = vmul.f32 %v32_v6, %v27_v4  ;;  %v35_v8 = vmul.f32 %v32_v6, %v28_v5 }
  0x97   :  { %v39_v9 = vpop.permute.xlu0 %38 }
  0x98   :  { %v41_v10 = vadd.f32 %v39_v9, %v34_v7  ;;  %v42_v11 = vadd.f32 %v39_v9, %v35_v8 }
  0x9a   :  { %v43_v12 = vmax.f32 %v41_v10, 0.0  ;;  %v44_v13 = vmax.f32 %v42_v11, 0.0 }
  0x9c   :  { %v45_v14 = vmin.f32 %v43_v12, 1.0  ;;  %v46_v15 = vmin.f32 %v44_v13, 1.0 }
  0x9e   :  { %47 = vst [vmem:[#allocation5] sm:$0xff] %v45_v14  ;;  %48 = vst [vmem:[#allocation5 + $0x8] sm:$0xff] %v46_v15 }
  0x9f   :  { %101 = shalt.err (!%p98_p12)
}
  0xa0   :  { %s102_s26 = scalar_lea.hbm %s163_s2, 256 }
  0xa1   :  { %p103_p13 = scmp.ne.s32.totalorder %s163_s2, %s102_s26  ;;  %p106_p0 = scmp.lt.u32.totalorder %s102_s26, %s163_s2 }
  0xa3   :  { %p108_p1 = pnand %p106_p0, %p103_p13 }
  0xa5   :  { %111 = shalt.err (!%p108_p1)
}
  0xa6   :  { %58 = dma.vmem_to_hbm [thread:$0]  %s56_s23, 256, %s163_s2, [#allocation4]  }
  0xa7   :  { %114 = dma.done.wait [#allocation4], 256  }
  0xa8   :  { %115 = vsyncadd [#allocation4], 4294967040 }
  0xa9   :  { %62 = vsyncpa [#allocation3], 1 }
  0xaa   :  { %63 = vsyncpa [#allocation4], 1 }

</bundles_post_ra>
